<compile_context>
chip_gen: v6e
topology: v6e:2x2x1
jax: 0.10.0
libtpu: 0.0.40
codegen_flags: <defaults>
</compile_context>

<pallas_src>
import functools
import math

import jax
import jax.numpy as jnp
from jax.experimental import pallas as pl
from jax.experimental.pallas import tpu as pltpu

N_EMBD = 32
NB_HEAD = 4
HEAD_SIZE = 8          # nb_head * head_size == N_EMBD, as in the usual GPT setup
T = 8                  # sequence length (<= CONTEXT_LENGTH)
B = 2                  # batch


def _mha_kernel(x_ref, w_ref, o_ref, att_ref, *,
                batch, seq, nb_head, head_size, n_embd):
    hd = nb_head * head_size           # concat width of all heads (== n_embd here)
    qkv_cols = 3 * hd

    # Unpack the single packed weight slab:
    #   rows 0..n_embd-1 : [ Wq_h0 .. Wq_hH | Wk... | Wv... | Wp ]
    #   row  n_embd      : [ zeros(3*hd)                    | bias ]
    w = w_ref[...]                                    # (n_embd+1, 3*hd + n_embd)
    w_qkv = w[:n_embd, :qkv_cols]                     # (n_embd, 3*hd)
    w_proj = w[:hd, qkv_cols:]                        # (hd, n_embd)
    bias = w[n_embd:n_embd + 1, qkv_cols:]            # (1, n_embd)

    # Single lane-dense QKV projection over all batch rows at once.
    x2d = x_ref[...].reshape(batch * seq, n_embd)                       # (B*T, C)
    qkv = jnp.dot(x2d, w_qkv, preferred_element_type=jnp.float32)       # (B*T, 3*hd)

    # Causal mask (shared across batch / heads).
    row = jax.lax.broadcasted_iota(jnp.int32, (seq, seq), 0)
    col = jax.lax.broadcasted_iota(jnp.int32, (seq, seq), 1)
    causal = col <= row
    neg_big = jnp.float32(-1e30)       # large finite negative (NaN-safe masking)
    scale = jnp.float32(head_size ** -0.5)

    # Attention scores / softmax strictly per batch element (static unroll:
    # B=2 x H=4 tiny (T, T) softmaxes).
    for b in range(batch):
        rows = slice(b * seq, (b + 1) * seq)
        for h in range(nb_head):
            q = qkv[rows, h * head_size:(h + 1) * head_size]                      # (T, hs)
            k = qkv[rows, hd + h * head_size: hd + (h + 1) * head_size]           # (T, hs)
            v = qkv[rows, 2 * hd + h * head_size: 2 * hd + (h + 1) * head_size]   # (T, hs)

            s = jnp.dot(q, k.T, preferred_element_type=jnp.float32) * scale       # (T, T)
            s = jnp.where(causal, s, neg_big)

            m = jnp.max(s, axis=-1, keepdims=True)
            p = jnp.exp(s - m)
            inv = pl.reciprocal(jnp.sum(p, axis=-1, keepdims=True), approx=True)
            p = p * inv

            # Write this head's output straight into its lane slice (no concat).
            att_ref[rows, h * head_size:(h + 1) * head_size] = jnp.dot(
                p, v, preferred_element_type=jnp.float32)

    # Output projection + bias; one store of the full (B, T, C) slab.
    out = jnp.dot(att_ref[...], w_proj, preferred_element_type=jnp.float32) + bias
    o_ref[...] = out.reshape(batch, seq, n_embd).astype(o_ref.dtype)


def _pack_weights(wq, wk, wv, wp, bp):
    """Pack (H, C, hs) q/k/v weights, (H*hs, C) proj weight and (1, C) bias into
    one (C+1, 3*H*hs + C) lane-dense slab (single DMA)."""
    nb_head, c, head_size = wq.shape
    hd = nb_head * head_size
    assert wp.shape == (hd, c) and hd == c, "packing assumes nb_head*head_size == N_EMBD"
    pack = lambda w: jnp.concatenate([w[h] for h in range(nb_head)], axis=-1)   # (C, hd)
    top = jnp.concatenate([pack(wq), pack(wk), pack(wv), wp], axis=-1)          # (C, 3*hd+C)
    bot = jnp.concatenate([jnp.zeros((1, 3 * hd), wp.dtype), bp], axis=-1)      # (1, 3*hd+C)
    return jnp.concatenate([top, bot], axis=0)                                  # (C+1, 3*hd+C)


def multihead_forward(x, wq, wk, wv, wp, bp, *, nb_head=NB_HEAD, head_size=HEAD_SIZE):
    """x: (B, T, C); wq/wk/wv: (nb_head, C, head_size); wp: (nb_head*head_size, C);
    bp: (1, C). Returns (B, T, C)."""
    b, t, c = x.shape
    hd = nb_head * head_size
    w_packed = _pack_weights(wq, wk, wv, wp, bp).astype(jnp.float32)

    kernel = functools.partial(_mha_kernel, batch=b, seq=t,
                               nb_head=nb_head, head_size=head_size, n_embd=c)
    return pl.pallas_call(
        kernel,
        out_shape=jax.ShapeDtypeStruct((b, t, c), x.dtype),
        grid_spec=pltpu.PrefetchScalarGridSpec(
            num_scalar_prefetch=0,
            grid=(1,),   # single invocation: whole batch + all weights in one block
            in_specs=[
                pl.BlockSpec((b, t, c), lambda i: (0, 0, 0)),
                pl.BlockSpec((c + 1, 3 * hd + c), lambda i: (0, 0)),
            ],
            out_specs=pl.BlockSpec((b, t, c), lambda i: (0, 0, 0)),
            scratch_shapes=[pltpu.VMEM((b * t, hd), jnp.float32)],
        ),
        cost_estimate=pl.CostEstimate(
            flops=2 * b * t * c * (3 * hd + c) + 4 * b * nb_head * t * t * head_size,
            transcendentals=b * nb_head * t * (t + 1),
            bytes_accessed=(x.size + w_packed.size + b * t * c) * 4,
        ),
    )(x, w_packed)


def _reference(x, wq, wk, wv, wp, bp, head_size=HEAD_SIZE):
    outs = []
    t = x.shape[1]
    causal = jnp.tril(jnp.ones((t, t), dtype=bool))
    for h in range(wq.shape[0]):
        q = x @ wq[h]
        k = x @ wk[h]
        v = x @ wv[h]
        s = (q @ jnp.swapaxes(k, -2, -1)) * head_size ** -0.5
        s = jnp.where(causal, s, -jnp.inf)
        p = jax.nn.softmax(s, axis=-1)
        outs.append(p @ v)
    cat = jnp.concatenate(outs, axis=-1)
    return cat @ wp + bp


if __name__ == "__main__":
    key = jax.random.PRNGKey(0)
    kx, kq, kk, kv, kp, kb = jax.random.split(key, 6)

    x = jax.random.normal(kx, (B, T, N_EMBD), dtype=jnp.float32)

    # Deterministic parameter init (stored directly as (in, out) matrices).
    scale = 1.0 / math.sqrt(N_EMBD)
    wq = jax.random.normal(kq, (NB_HEAD, N_EMBD, HEAD_SIZE), jnp.float32) * scale
    wk = jax.random.normal(kk, (NB_HEAD, N_EMBD, HEAD_SIZE), jnp.float32) * scale
    wv = jax.random.normal(kv, (NB_HEAD, N_EMBD, HEAD_SIZE), jnp.float32) * scale
    wp = jax.random.normal(kp, (NB_HEAD * HEAD_SIZE, N_EMBD), jnp.float32) * scale
    bp = jax.random.normal(kb, (1, N_EMBD), jnp.float32) * 0.01

    out = multihead_forward(x, wq, wk, wv, wp, bp)
    out = jax.block_until_ready(out)

    ref = _reference(x, wq, wk, wv, wp, bp)
    assert out.shape == (B, T, N_EMBD)
    # Tolerance slightly loosened because the softmax denominator uses the
    # approximate EUP reciprocal (pl.reciprocal(..., approx=True)).
    assert jnp.allclose(out, ref, atol=1e-2, rtol=1e-2), "mismatch vs reference"

    print("KERNEL_OK")
</pallas_src>

<mosaic_0001>
module attributes {stable_mosaic.version = 11 : i64} {
  func.func @_mha_kernel(%arg0: i32, %arg1: memref<2x8x32xf32, #tpu.memory_space<vmem>>, %arg2: memref<33x128xf32, #tpu.memory_space<vmem>>, %arg3: memref<2x8x32xf32, #tpu.memory_space<vmem>>, %arg4: memref<16x32xf32, #tpu.memory_space<vmem>>) attributes {dimension_semantics = [#tpu.dimension_semantics<arbitrary>], iteration_bounds = array<i64: 1>, scalar_prefetch = 0 : i64, scratch_operands = 1 : i64, tpu.core_type = #tpu.core_type<tc>, window_params = [{pipeline_mode = #tpu.pipeline_mode<synchronous>, transform_indices = @transform_0, window_bounds = array<i64: 2, 8, 32>}, {pipeline_mode = #tpu.pipeline_mode<synchronous>, transform_indices = @transform_1, window_bounds = array<i64: 33, 128>}, {pipeline_mode = #tpu.pipeline_mode<synchronous>, transform_indices = @transform_2, window_bounds = array<i64: 2, 8, 32>}]} {
    %c0 = arith.constant 0 : index
    %c0_0 = arith.constant 0 : index
    %0 = vector.load %arg2[%c0, %c0_0] : memref<33x128xf32, #tpu.memory_space<vmem>>, vector<33x128xf32>
    %1 = vector.extract_strided_slice %0 {offsets = [0, 0], sizes = [32, 96], strides = [1, 1]} : vector<33x128xf32> to vector<32x96xf32>
    %2 = vector.extract_strided_slice %0 {offsets = [0, 96], sizes = [32, 32], strides = [1, 1]} : vector<33x128xf32> to vector<32x32xf32>
    %3 = vector.extract_strided_slice %0 {offsets = [32, 96], sizes = [1, 32], strides = [1, 1]} : vector<33x128xf32> to vector<1x32xf32>
    %c0_1 = arith.constant 0 : index
    %c0_2 = arith.constant 0 : index
    %c0_3 = arith.constant 0 : index
    %4 = vector.load %arg1[%c0_1, %c0_2, %c0_3] : memref<2x8x32xf32, #tpu.memory_space<vmem>>, vector<2x8x32xf32>
    %5 = vector.shape_cast %4 : vector<2x8x32xf32> to vector<16x32xf32>
    %cst = arith.constant dense<0.000000e+00> : vector<16x96xf32>
    %6 = tpu.matmul %5, %1, %cst {dimension_numbers = #tpu.dot_dimension_numbers<[1], [0], [0], [1], [0, 0, 1, 1], [], []>} : vector<16x32xf32>, vector<32x96xf32>, vector<16x96xf32> -> vector<16x96xf32>
    %7 = tpu.iota {dimensions = array<i32: 0>} : vector<8x8xi32>
    %8 = tpu.iota {dimensions = array<i32: 1>} : vector<8x8xi32>
    %9 = arith.cmpi sle, %8, %7 : vector<8x8xi32>
    %10 = vector.extract_strided_slice %6 {offsets = [0, 0], sizes = [8, 8], strides = [1, 1]} : vector<16x96xf32> to vector<8x8xf32>
    %11 = vector.extract_strided_slice %6 {offsets = [0, 32], sizes = [8, 8], strides = [1, 1]} : vector<16x96xf32> to vector<8x8xf32>
    %12 = vector.extract_strided_slice %6 {offsets = [0, 64], sizes = [8, 8], strides = [1, 1]} : vector<16x96xf32> to vector<8x8xf32>
    %13 = tpu.transpose %11, [1, 0] : vector<8x8xf32> -> vector<8x8xf32>
    %cst_4 = arith.constant dense<0.000000e+00> : vector<8x8xf32>
    %14 = tpu.matmul %10, %13, %cst_4 {dimension_numbers = #tpu.dot_dimension_numbers<[1], [0], [0], [1], [0, 0, 1, 1], [], []>} : vector<8x8xf32>, vector<8x8xf32>, vector<8x8xf32> -> vector<8x8xf32>
    %cst_5 = arith.constant 0.353553385 : f32
    %15 = vector.broadcast %cst_5 : f32 to vector<8x8xf32>
    %16 = arith.mulf %14, %15 : vector<8x8xf32>
    %cst_6 = arith.constant -1.000000e+30 : f32
    %17 = vector.broadcast %cst_6 : f32 to vector<8x8xf32>
    %18 = arith.select %9, %16, %17 : vector<8x8xi1>, vector<8x8xf32>
    %cst_7 = arith.constant dense<0xFF800000> : vector<8xf32>
    %19 = vector.multi_reduction <maximumf>, %18, %cst_7 [1] : vector<8x8xf32> to vector<8xf32>
    %20 = vector.shape_cast %19 : vector<8xf32> to vector<8x1xf32>
    %21 = vector.broadcast %20 : vector<8x1xf32> to vector<8x8xf32>
    %22 = arith.subf %18, %21 : vector<8x8xf32>
    %23 = math.exp %22 : vector<8x8xf32>
    %cst_8 = arith.constant dense<0.000000e+00> : vector<8xf32>
    %24 = vector.multi_reduction <add>, %23, %cst_8 [1] : vector<8x8xf32> to vector<8xf32>
    %25 = vector.shape_cast %24 : vector<8xf32> to vector<8x1xf32>
    %26 = tpu.reciprocal %25 {approx = true} : vector<8x1xf32> -> vector<8x1xf32>
    %27 = vector.broadcast %26 : vector<8x1xf32> to vector<8x8xf32>
    %28 = arith.mulf %23, %27 : vector<8x8xf32>
    %cst_9 = arith.constant dense<0.000000e+00> : vector<8x8xf32>
    %29 = tpu.matmul %28, %12, %cst_9 {dimension_numbers = #tpu.dot_dimension_numbers<[1], [0], [0], [1], [0, 0, 1, 1], [], []>} : vector<8x8xf32>, vector<8x8xf32>, vector<8x8xf32> -> vector<8x8xf32>
    %c0_10 = arith.constant 0 : index
    %c0_11 = arith.constant 0 : index
    %30 = vector.load %arg4[%c0_10, %c0_11] : memref<16x32xf32, #tpu.memory_space<vmem>>, vector<8x8xf32>
    tpu.vector_store %arg4[%c0_10, %c0_11], %29 {strides = array<i32>} : memref<16x32xf32, #tpu.memory_space<vmem>>, vector<8x8xf32>,
    %31 = vector.extract_strided_slice %6 {offsets = [0, 8], sizes = [8, 8], strides = [1, 1]} : vector<16x96xf32> to vector<8x8xf32>
    %32 = vector.extract_strided_slice %6 {offsets = [0, 40], sizes = [8, 8], strides = [1, 1]} : vector<16x96xf32> to vector<8x8xf32>
    %33 = vector.extract_strided_slice %6 {offsets = [0, 72], sizes = [8, 8], strides = [1, 1]} : vector<16x96xf32> to vector<8x8xf32>
    %34 = tpu.transpose %32, [1, 0] : vector<8x8xf32> -> vector<8x8xf32>
    %cst_12 = arith.constant dense<0.000000e+00> : vector<8x8xf32>
    %35 = tpu.matmul %31, %34, %cst_12 {dimension_numbers = #tpu.dot_dimension_numbers<[1], [0], [0], [1], [0, 0, 1, 1], [], []>} : vector<8x8xf32>, vector<8x8xf32>, vector<8x8xf32> -> vector<8x8xf32>
    %cst_13 = arith.constant 0.353553385 : f32
    %36 = vector.broadcast %cst_13 : f32 to vector<8x8xf32>
    %37 = arith.mulf %35, %36 : vector<8x8xf32>
    %cst_14 = arith.constant -1.000000e+30 : f32
    %38 = vector.broadcast %cst_14 : f32 to vector<8x8xf32>
    %39 = arith.select %9, %37, %38 : vector<8x8xi1>, vector<8x8xf32>
    %cst_15 = arith.constant dense<0xFF800000> : vector<8xf32>
    %40 = vector.multi_reduction <maximumf>, %39, %cst_15 [1] : vector<8x8xf32> to vector<8xf32>
    %41 = vector.shape_cast %40 : vector<8xf32> to vector<8x1xf32>
    %42 = vector.broadcast %41 : vector<8x1xf32> to vector<8x8xf32>
    %43 = arith.subf %39, %42 : vector<8x8xf32>
    %44 = math.exp %43 : vector<8x8xf32>
    %cst_16 = arith.constant dense<0.000000e+00> : vector<8xf32>
    %45 = vector.multi_reduction <add>, %44, %cst_16 [1] : vector<8x8xf32> to vector<8xf32>
    %46 = vector.shape_cast %45 : vector<8xf32> to vector<8x1xf32>
    %47 = tpu.reciprocal %46 {approx = true} : vector<8x1xf32> -> vector<8x1xf32>
    %48 = vector.broadcast %47 : vector<8x1xf32> to vector<8x8xf32>
    %49 = arith.mulf %44, %48 : vector<8x8xf32>
    %cst_17 = arith.constant dense<0.000000e+00> : vector<8x8xf32>
    %50 = tpu.matmul %49, %33, %cst_17 {dimension_numbers = #tpu.dot_dimension_numbers<[1], [0], [0], [1], [0, 0, 1, 1], [], []>} : vector<8x8xf32>, vector<8x8xf32>, vector<8x8xf32> -> vector<8x8xf32>
    %c0_18 = arith.constant 0 : index
    %c8 = arith.constant 8 : index
    %51 = vector.load %arg4[%c0_18, %c8] : memref<16x32xf32, #tpu.memory_space<vmem>>, vector<8x8xf32>
    tpu.vector_store %arg4[%c0_18, %c8], %50 {strides = array<i32>} : memref<16x32xf32, #tpu.memory_space<vmem>>, vector<8x8xf32>,
    %52 = vector.extract_strided_slice %6 {offsets = [0, 16], sizes = [8, 8], strides = [1, 1]} : vector<16x96xf32> to vector<8x8xf32>
    %53 = vector.extract_strided_slice %6 {offsets = [0, 48], sizes = [8, 8], strides = [1, 1]} : vector<16x96xf32> to vector<8x8xf32>
    %54 = vector.extract_strided_slice %6 {offsets = [0, 80], sizes = [8, 8], strides = [1, 1]} : vector<16x96xf32> to vector<8x8xf32>
    %55 = tpu.transpose %53, [1, 0] : vector<8x8xf32> -> vector<8x8xf32>
    %cst_19 = arith.constant dense<0.000000e+00> : vector<8x8xf32>
    %56 = tpu.matmul %52, %55, %cst_19 {dimension_numbers = #tpu.dot_dimension_numbers<[1], [0], [0], [1], [0, 0, 1, 1], [], []>} : vector<8x8xf32>, vector<8x8xf32>, vector<8x8xf32> -> vector<8x8xf32>
    %cst_20 = arith.constant 0.353553385 : f32
    %57 = vector.broadcast %cst_20 : f32 to vector<8x8xf32>
    %58 = arith.mulf %56, %57 : vector<8x8xf32>
    %cst_21 = arith.constant -1.000000e+30 : f32
    %59 = vector.broadcast %cst_21 : f32 to vector<8x8xf32>
    %60 = arith.select %9, %58, %59 : vector<8x8xi1>, vector<8x8xf32>
    %cst_22 = arith.constant dense<0xFF800000> : vector<8xf32>
    %61 = vector.multi_reduction <maximumf>, %60, %cst_22 [1] : vector<8x8xf32> to vector<8xf32>
    %62 = vector.shape_cast %61 : vector<8xf32> to vector<8x1xf32>
    %63 = vector.broadcast %62 : vector<8x1xf32> to vector<8x8xf32>
    %64 = arith.subf %60, %63 : vector<8x8xf32>
    %65 = math.exp %64 : vector<8x8xf32>
    %cst_23 = arith.constant dense<0.000000e+00> : vector<8xf32>
    %66 = vector.multi_reduction <add>, %65, %cst_23 [1] : vector<8x8xf32> to vector<8xf32>
    %67 = vector.shape_cast %66 : vector<8xf32> to vector<8x1xf32>
    %68 = tpu.reciprocal %67 {approx = true} : vector<8x1xf32> -> vector<8x1xf32>
    %69 = vector.broadcast %68 : vector<8x1xf32> to vector<8x8xf32>
    %70 = arith.mulf %65, %69 : vector<8x8xf32>
    %cst_24 = arith.constant dense<0.000000e+00> : vector<8x8xf32>
    %71 = tpu.matmul %70, %54, %cst_24 {dimension_numbers = #tpu.dot_dimension_numbers<[1], [0], [0], [1], [0, 0, 1, 1], [], []>} : vector<8x8xf32>, vector<8x8xf32>, vector<8x8xf32> -> vector<8x8xf32>
    %c0_25 = arith.constant 0 : index
    %c16 = arith.constant 16 : index
    %72 = vector.load %arg4[%c0_25, %c16] : memref<16x32xf32, #tpu.memory_space<vmem>>, vector<8x8xf32>
    tpu.vector_store %arg4[%c0_25, %c16], %71 {strides = array<i32>} : memref<16x32xf32, #tpu.memory_space<vmem>>, vector<8x8xf32>,
    %73 = vector.extract_strided_slice %6 {offsets = [0, 24], sizes = [8, 8], strides = [1, 1]} : vector<16x96xf32> to vector<8x8xf32>
    %74 = vector.extract_strided_slice %6 {offsets = [0, 56], sizes = [8, 8], strides = [1, 1]} : vector<16x96xf32> to vector<8x8xf32>
    %75 = vector.extract_strided_slice %6 {offsets = [0, 88], sizes = [8, 8], strides = [1, 1]} : vector<16x96xf32> to vector<8x8xf32>
    %76 = tpu.transpose %74, [1, 0] : vector<8x8xf32> -> vector<8x8xf32>
    %cst_26 = arith.constant dense<0.000000e+00> : vector<8x8xf32>
    %77 = tpu.matmul %73, %76, %cst_26 {dimension_numbers = #tpu.dot_dimension_numbers<[1], [0], [0], [1], [0, 0, 1, 1], [], []>} : vector<8x8xf32>, vector<8x8xf32>, vector<8x8xf32> -> vector<8x8xf32>
    %cst_27 = arith.constant 0.353553385 : f32
    %78 = vector.broadcast %cst_27 : f32 to vector<8x8xf32>
    %79 = arith.mulf %77, %78 : vector<8x8xf32>
    %cst_28 = arith.constant -1.000000e+30 : f32
    %80 = vector.broadcast %cst_28 : f32 to vector<8x8xf32>
    %81 = arith.select %9, %79, %80 : vector<8x8xi1>, vector<8x8xf32>
    %cst_29 = arith.constant dense<0xFF800000> : vector<8xf32>
    %82 = vector.multi_reduction <maximumf>, %81, %cst_29 [1] : vector<8x8xf32> to vector<8xf32>
    %83 = vector.shape_cast %82 : vector<8xf32> to vector<8x1xf32>
    %84 = vector.broadcast %83 : vector<8x1xf32> to vector<8x8xf32>
    %85 = arith.subf %81, %84 : vector<8x8xf32>
    %86 = math.exp %85 : vector<8x8xf32>
    %cst_30 = arith.constant dense<0.000000e+00> : vector<8xf32>
    %87 = vector.multi_reduction <add>, %86, %cst_30 [1] : vector<8x8xf32> to vector<8xf32>
    %88 = vector.shape_cast %87 : vector<8xf32> to vector<8x1xf32>
    %89 = tpu.reciprocal %88 {approx = true} : vector<8x1xf32> -> vector<8x1xf32>
    %90 = vector.broadcast %89 : vector<8x1xf32> to vector<8x8xf32>
    %91 = arith.mulf %86, %90 : vector<8x8xf32>
    %cst_31 = arith.constant dense<0.000000e+00> : vector<8x8xf32>
    %92 = tpu.matmul %91, %75, %cst_31 {dimension_numbers = #tpu.dot_dimension_numbers<[1], [0], [0], [1], [0, 0, 1, 1], [], []>} : vector<8x8xf32>, vector<8x8xf32>, vector<8x8xf32> -> vector<8x8xf32>
    %c0_32 = arith.constant 0 : index
    %c24 = arith.constant 24 : index
    %93 = vector.load %arg4[%c0_32, %c24] : memref<16x32xf32, #tpu.memory_space<vmem>>, vector<8x8xf32>
    tpu.vector_store %arg4[%c0_32, %c24], %92 {strides = array<i32>} : memref<16x32xf32, #tpu.memory_space<vmem>>, vector<8x8xf32>,
    %94 = vector.extract_strided_slice %6 {offsets = [8, 0], sizes = [8, 8], strides = [1, 1]} : vector<16x96xf32> to vector<8x8xf32>
    %95 = vector.extract_strided_slice %6 {offsets = [8, 32], sizes = [8, 8], strides = [1, 1]} : vector<16x96xf32> to vector<8x8xf32>
    %96 = vector.extract_strided_slice %6 {offsets = [8, 64], sizes = [8, 8], strides = [1, 1]} : vector<16x96xf32> to vector<8x8xf32>
    %97 = tpu.transpose %95, [1, 0] : vector<8x8xf32> -> vector<8x8xf32>
    %cst_33 = arith.constant dense<0.000000e+00> : vector<8x8xf32>
    %98 = tpu.matmul %94, %97, %cst_33 {dimension_numbers = #tpu.dot_dimension_numbers<[1], [0], [0], [1], [0, 0, 1, 1], [], []>} : vector<8x8xf32>, vector<8x8xf32>, vector<8x8xf32> -> vector<8x8xf32>
    %cst_34 = arith.constant 0.353553385 : f32
    %99 = vector.broadcast %cst_34 : f32 to vector<8x8xf32>
    %100 = arith.mulf %98, %99 : vector<8x8xf32>
    %cst_35 = arith.constant -1.000000e+30 : f32
    %101 = vector.broadcast %cst_35 : f32 to vector<8x8xf32>
    %102 = arith.select %9, %100, %101 : vector<8x8xi1>, vector<8x8xf32>
    %cst_36 = arith.constant dense<0xFF800000> : vector<8xf32>
    %103 = vector.multi_reduction <maximumf>, %102, %cst_36 [1] : vector<8x8xf32> to vector<8xf32>
    %104 = vector.shape_cast %103 : vector<8xf32> to vector<8x1xf32>
    %105 = vector.broadcast %104 : vector<8x1xf32> to vector<8x8xf32>
    %106 = arith.subf %102, %105 : vector<8x8xf32>
    %107 = math.exp %106 : vector<8x8xf32>
    %cst_37 = arith.constant dense<0.000000e+00> : vector<8xf32>
    %108 = vector.multi_reduction <add>, %107, %cst_37 [1] : vector<8x8xf32> to vector<8xf32>
    %109 = vector.shape_cast %108 : vector<8xf32> to vector<8x1xf32>
    %110 = tpu.reciprocal %109 {approx = true} : vector<8x1xf32> -> vector<8x1xf32>
    %111 = vector.broadcast %110 : vector<8x1xf32> to vector<8x8xf32>
    %112 = arith.mulf %107, %111 : vector<8x8xf32>
    %cst_38 = arith.constant dense<0.000000e+00> : vector<8x8xf32>
    %113 = tpu.matmul %112, %96, %cst_38 {dimension_numbers = #tpu.dot_dimension_numbers<[1], [0], [0], [1], [0, 0, 1, 1], [], []>} : vector<8x8xf32>, vector<8x8xf32>, vector<8x8xf32> -> vector<8x8xf32>
    %c8_39 = arith.constant 8 : index
    %c0_40 = arith.constant 0 : index
    %114 = vector.load %arg4[%c8_39, %c0_40] : memref<16x32xf32, #tpu.memory_space<vmem>>, vector<8x8xf32>
    tpu.vector_store %arg4[%c8_39, %c0_40], %113 {strides = array<i32>} : memref<16x32xf32, #tpu.memory_space<vmem>>, vector<8x8xf32>,
    %115 = vector.extract_strided_slice %6 {offsets = [8, 8], sizes = [8, 8], strides = [1, 1]} : vector<16x96xf32> to vector<8x8xf32>
    %116 = vector.extract_strided_slice %6 {offsets = [8, 40], sizes = [8, 8], strides = [1, 1]} : vector<16x96xf32> to vector<8x8xf32>
    %117 = vector.extract_strided_slice %6 {offsets = [8, 72], sizes = [8, 8], strides = [1, 1]} : vector<16x96xf32> to vector<8x8xf32>
    %118 = tpu.transpose %116, [1, 0] : vector<8x8xf32> -> vector<8x8xf32>
    %cst_41 = arith.constant dense<0.000000e+00> : vector<8x8xf32>
    %119 = tpu.matmul %115, %118, %cst_41 {dimension_numbers = #tpu.dot_dimension_numbers<[1], [0], [0], [1], [0, 0, 1, 1], [], []>} : vector<8x8xf32>, vector<8x8xf32>, vector<8x8xf32> -> vector<8x8xf32>
    %cst_42 = arith.constant 0.353553385 : f32
    %120 = vector.broadcast %cst_42 : f32 to vector<8x8xf32>
    %121 = arith.mulf %119, %120 : vector<8x8xf32>
    %cst_43 = arith.constant -1.000000e+30 : f32
    %122 = vector.broadcast %cst_43 : f32 to vector<8x8xf32>
    %123 = arith.select %9, %121, %122 : vector<8x8xi1>, vector<8x8xf32>
    %cst_44 = arith.constant dense<0xFF800000> : vector<8xf32>
    %124 = vector.multi_reduction <maximumf>, %123, %cst_44 [1] : vector<8x8xf32> to vector<8xf32>
    %125 = vector.shape_cast %124 : vector<8xf32> to vector<8x1xf32>
    %126 = vector.broadcast %125 : vector<8x1xf32> to vector<8x8xf32>
    %127 = arith.subf %123, %126 : vector<8x8xf32>
    %128 = math.exp %127 : vector<8x8xf32>
    %cst_45 = arith.constant dense<0.000000e+00> : vector<8xf32>
    %129 = vector.multi_reduction <add>, %128, %cst_45 [1] : vector<8x8xf32> to vector<8xf32>
    %130 = vector.shape_cast %129 : vector<8xf32> to vector<8x1xf32>
    %131 = tpu.reciprocal %130 {approx = true} : vector<8x1xf32> -> vector<8x1xf32>
    %132 = vector.broadcast %131 : vector<8x1xf32> to vector<8x8xf32>
    %133 = arith.mulf %128, %132 : vector<8x8xf32>
    %cst_46 = arith.constant dense<0.000000e+00> : vector<8x8xf32>
    %134 = tpu.matmul %133, %117, %cst_46 {dimension_numbers = #tpu.dot_dimension_numbers<[1], [0], [0], [1], [0, 0, 1, 1], [], []>} : vector<8x8xf32>, vector<8x8xf32>, vector<8x8xf32> -> vector<8x8xf32>
    %c8_47 = arith.constant 8 : index
    %c8_48 = arith.constant 8 : index
    %135 = vector.load %arg4[%c8_47, %c8_48] : memref<16x32xf32, #tpu.memory_space<vmem>>, vector<8x8xf32>
    tpu.vector_store %arg4[%c8_47, %c8_48], %134 {strides = array<i32>} : memref<16x32xf32, #tpu.memory_space<vmem>>, vector<8x8xf32>,
    %136 = vector.extract_strided_slice %6 {offsets = [8, 16], sizes = [8, 8], strides = [1, 1]} : vector<16x96xf32> to vector<8x8xf32>
    %137 = vector.extract_strided_slice %6 {offsets = [8, 48], sizes = [8, 8], strides = [1, 1]} : vector<16x96xf32> to vector<8x8xf32>
    %138 = vector.extract_strided_slice %6 {offsets = [8, 80], sizes = [8, 8], strides = [1, 1]} : vector<16x96xf32> to vector<8x8xf32>
    %139 = tpu.transpose %137, [1, 0] : vector<8x8xf32> -> vector<8x8xf32>
    %cst_49 = arith.constant dense<0.000000e+00> : vector<8x8xf32>
    %140 = tpu.matmul %136, %139, %cst_49 {dimension_numbers = #tpu.dot_dimension_numbers<[1], [0], [0], [1], [0, 0, 1, 1], [], []>} : vector<8x8xf32>, vector<8x8xf32>, vector<8x8xf32> -> vector<8x8xf32>
    %cst_50 = arith.constant 0.353553385 : f32
    %141 = vector.broadcast %cst_50 : f32 to vector<8x8xf32>
    %142 = arith.mulf %140, %141 : vector<8x8xf32>
    %cst_51 = arith.constant -1.000000e+30 : f32
    %143 = vector.broadcast %cst_51 : f32 to vector<8x8xf32>
    %144 = arith.select %9, %142, %143 : vector<8x8xi1>, vector<8x8xf32>
    %cst_52 = arith.constant dense<0xFF800000> : vector<8xf32>
    %145 = vector.multi_reduction <maximumf>, %144, %cst_52 [1] : vector<8x8xf32> to vector<8xf32>
    %146 = vector.shape_cast %145 : vector<8xf32> to vector<8x1xf32>
    %147 = vector.broadcast %146 : vector<8x1xf32> to vector<8x8xf32>
    %148 = arith.subf %144, %147 : vector<8x8xf32>
    %149 = math.exp %148 : vector<8x8xf32>
    %cst_53 = arith.constant dense<0.000000e+00> : vector<8xf32>
    %150 = vector.multi_reduction <add>, %149, %cst_53 [1] : vector<8x8xf32> to vector<8xf32>
    %151 = vector.shape_cast %150 : vector<8xf32> to vector<8x1xf32>
    %152 = tpu.reciprocal %151 {approx = true} : vector<8x1xf32> -> vector<8x1xf32>
    %153 = vector.broadcast %152 : vector<8x1xf32> to vector<8x8xf32>
    %154 = arith.mulf %149, %153 : vector<8x8xf32>
    %cst_54 = arith.constant dense<0.000000e+00> : vector<8x8xf32>
    %155 = tpu.matmul %154, %138, %cst_54 {dimension_numbers = #tpu.dot_dimension_numbers<[1], [0], [0], [1], [0, 0, 1, 1], [], []>} : vector<8x8xf32>, vector<8x8xf32>, vector<8x8xf32> -> vector<8x8xf32>
    %c8_55 = arith.constant 8 : index
    %c16_56 = arith.constant 16 : index
    %156 = vector.load %arg4[%c8_55, %c16_56] : memref<16x32xf32, #tpu.memory_space<vmem>>, vector<8x8xf32>
    tpu.vector_store %arg4[%c8_55, %c16_56], %155 {strides = array<i32>} : memref<16x32xf32, #tpu.memory_space<vmem>>, vector<8x8xf32>,
    %157 = vector.extract_strided_slice %6 {offsets = [8, 24], sizes = [8, 8], strides = [1, 1]} : vector<16x96xf32> to vector<8x8xf32>
    %158 = vector.extract_strided_slice %6 {offsets = [8, 56], sizes = [8, 8], strides = [1, 1]} : vector<16x96xf32> to vector<8x8xf32>
    %159 = vector.extract_strided_slice %6 {offsets = [8, 88], sizes = [8, 8], strides = [1, 1]} : vector<16x96xf32> to vector<8x8xf32>
    %160 = tpu.transpose %158, [1, 0] : vector<8x8xf32> -> vector<8x8xf32>
    %cst_57 = arith.constant dense<0.000000e+00> : vector<8x8xf32>
    %161 = tpu.matmul %157, %160, %cst_57 {dimension_numbers = #tpu.dot_dimension_numbers<[1], [0], [0], [1], [0, 0, 1, 1], [], []>} : vector<8x8xf32>, vector<8x8xf32>, vector<8x8xf32> -> vector<8x8xf32>
    %cst_58 = arith.constant 0.353553385 : f32
    %162 = vector.broadcast %cst_58 : f32 to vector<8x8xf32>
    %163 = arith.mulf %161, %162 : vector<8x8xf32>
    %cst_59 = arith.constant -1.000000e+30 : f32
    %164 = vector.broadcast %cst_59 : f32 to vector<8x8xf32>
    %165 = arith.select %9, %163, %164 : vector<8x8xi1>, vector<8x8xf32>
    %cst_60 = arith.constant dense<0xFF800000> : vector<8xf32>
    %166 = vector.multi_reduction <maximumf>, %165, %cst_60 [1] : vector<8x8xf32> to vector<8xf32>
    %167 = vector.shape_cast %166 : vector<8xf32> to vector<8x1xf32>
    %168 = vector.broadcast %167 : vector<8x1xf32> to vector<8x8xf32>
    %169 = arith.subf %165, %168 : vector<8x8xf32>
    %170 = math.exp %169 : vector<8x8xf32>
    %cst_61 = arith.constant dense<0.000000e+00> : vector<8xf32>
    %171 = vector.multi_reduction <add>, %170, %cst_61 [1] : vector<8x8xf32> to vector<8xf32>
    %172 = vector.shape_cast %171 : vector<8xf32> to vector<8x1xf32>
    %173 = tpu.reciprocal %172 {approx = true} : vector<8x1xf32> -> vector<8x1xf32>
    %174 = vector.broadcast %173 : vector<8x1xf32> to vector<8x8xf32>
    %175 = arith.mulf %170, %174 : vector<8x8xf32>
    %cst_62 = arith.constant dense<0.000000e+00> : vector<8x8xf32>
    %176 = tpu.matmul %175, %159, %cst_62 {dimension_numbers = #tpu.dot_dimension_numbers<[1], [0], [0], [1], [0, 0, 1, 1], [], []>} : vector<8x8xf32>, vector<8x8xf32>, vector<8x8xf32> -> vector<8x8xf32>
    %c8_63 = arith.constant 8 : index
    %c24_64 = arith.constant 24 : index
    %177 = vector.load %arg4[%c8_63, %c24_64] : memref<16x32xf32, #tpu.memory_space<vmem>>, vector<8x8xf32>
    tpu.vector_store %arg4[%c8_63, %c24_64], %176 {strides = array<i32>} : memref<16x32xf32, #tpu.memory_space<vmem>>, vector<8x8xf32>,
    %c0_65 = arith.constant 0 : index
    %c0_66 = arith.constant 0 : index
    %178 = vector.load %arg4[%c0_65, %c0_66] : memref<16x32xf32, #tpu.memory_space<vmem>>, vector<16x32xf32>
    %cst_67 = arith.constant dense<0.000000e+00> : vector<16x32xf32>
    %179 = tpu.matmul %178, %2, %cst_67 {dimension_numbers = #tpu.dot_dimension_numbers<[1], [0], [0], [1], [0, 0, 1, 1], [], []>} : vector<16x32xf32>, vector<32x32xf32>, vector<16x32xf32> -> vector<16x32xf32>
    %180 = vector.broadcast %3 : vector<1x32xf32> to vector<16x32xf32>
    %181 = arith.addf %179, %180 : vector<16x32xf32>
    %182 = vector.shape_cast %181 : vector<16x32xf32> to vector<2x8x32xf32>
    %c0_68 = arith.constant 0 : index
    %c0_69 = arith.constant 0 : index
    %c0_70 = arith.constant 0 : index
    %183 = vector.load %arg3[%c0_68, %c0_69, %c0_70] : memref<2x8x32xf32, #tpu.memory_space<vmem>>, vector<2x8x32xf32>
    tpu.vector_store %arg3[%c0_68, %c0_69, %c0_70], %182 {strides = array<i32>} : memref<2x8x32xf32, #tpu.memory_space<vmem>>, vector<2x8x32xf32>,
    return
  }
  func.func @transform_0(%arg0: i32) -> (i32, i32, i32) {
    %c0_i32 = arith.constant 0 : i32
    %c0_i32_0 = arith.constant 0 : i32
    %c0_i32_1 = arith.constant 0 : i32
    %c0_i32_2 = arith.constant 0 : i32
    return %c0_i32, %c0_i32_0, %c0_i32_1 : i32, i32, i32
  }
  func.func @transform_1(%arg0: i32) -> (i32, i32) {
    %c0_i32 = arith.constant 0 : i32
    %c0_i32_0 = arith.constant 0 : i32
    %c0_i32_1 = arith.constant 0 : i32
    return %c0_i32, %c0_i32_0 : i32, i32
  }
  func.func @transform_2(%arg0: i32) -> (i32, i32, i32) {
    %c0_i32 = arith.constant 0 : i32
    %c0_i32_0 = arith.constant 0 : i32
    %c0_i32_1 = arith.constant 0 : i32
    %c0_i32_2 = arith.constant 0 : i32
    return %c0_i32, %c0_i32_0, %c0_i32_1 : i32, i32, i32
  }
}

</mosaic_0001>

<bundles_post_ra>
// kernel: tpu_custom_call.1
= control target key start
LH: loop header
LB: loop body
LE: loop exit
PB: predicated region body
PF: predicated region fallthrough
CT: control target
= control target key end

     0   :  { %7 = vsyncpa [#allocation4], 0  ;;  %s2195_s0 = inlined_call_operand.hbm [shape: f32[2,8,32], index: 0, kind: input, shape index: {}]   ;;  %s2196_s1 = inlined_call_operand.hbm [shape: f32[33,128], index: 1, kind: input, shape index: {}]   ;;  %s2197_s2 = inlined_call_operand.hbm [shape: f32[2,8,32], index: 2, kind: output, shape index: {}]  }
   0x1   :  { %8 = vsyncpa [#allocation7], 0 }
   0x2   :  { %9 = vsyncpa [#allocation5], 0  ;;  %s1925_s9 = smov [#allocation3]  }
   0x3   :  { %s15_s10 = sshll.u32 %s1925_s9, 4  ;;  %s16_s10 = int_to_ptr.vmem [resolvable:$true] %s15_s10 }
   0x4   :  { %s1867_s11 = scalar_lea.vmem %s16_s10, 256  ;;  %p1872_p1 = scmp.lt.s32.totalorder %s16_s10, %s16_s10 }
   0x5   :  { %p1868_p0 = scmp.ne.s32.totalorder %s16_s10, %s1867_s11  ;;  %p1873_p2 = scmp.lt.s32.totalorder %s1867_s11, %s1867_s11 }
   0x7   :  { %p1874_p3 = por %p1873_p2, %p1872_p1 }
   0x9   :  { %p1875_p4 = pnand %p1874_p3, %p1868_p0 }
   0xb   :  { %1878 = shalt.err (!%p1875_p4)
}
   0xc   :  { %s1926_s12 = smov 128   ;;  %s1927_s13 = smov 8  }
   0xd   :  { %21 = dma.hbm_to_vmem [thread:$0]  %s2195_s0, 256, %s16_s10, [#allocation4], %s1926_s12, %s1926_s12, %s1927_s13  }
   0xe   :  { %s1928_s16 = smov [#allocation6]  }
   0xf   :  { %s27_s17 = sshll.u32 %s1928_s16, 4  ;;  %s28_s17 = int_to_ptr.vmem [resolvable:$true] %s27_s17 }
  0x10   :  { %s1887_s18 = scalar_lea.vmem %s28_s17, 640  ;;  %p1892_p6 = scmp.lt.s32.totalorder %s28_s17, %s28_s17 }
  0x11   :  { %p1888_p5 = scmp.ne.s32.totalorder %s28_s17, %s1887_s18  ;;  %p1893_p7 = scmp.lt.s32.totalorder %s1887_s18, %s1887_s18 }
  0x13   :  { %p1894_p8 = por %p1893_p7, %p1892_p6 }
  0x15   :  { %p1895_p9 = pnand %p1894_p8, %p1888_p5 }
  0x17   :  { %1898 = shalt.err (!%p1895_p9)
}
  0x18   :  { %33 = dma.hbm_to_vmem [thread:$0]  %s2196_s1, 640, %s28_s17, [#allocation7], %s1926_s12, %s1926_s12, %s1927_s13  }
  0x19   :  { %1919 = dma.done.wait [#allocation4], 256  }
  0x1a   :  { %1920 = vsyncadd [#allocation4], 4294967040 }
  0x1b   :  { %1921 = dma.done.wait [#allocation7], 640  }
  0x1c   :  { %1922 = vsyncadd [#allocation7], 4294966656  ;;  %vm47_vm0 = vcmask 261120   ;;  %v1973_v0 = vld [vmem:[#allocation6 + $0x18] sm:$0xff]  ;;  %v1975_v1 = vld [vmem:[#allocation6 + $0x10] sm:$0xff]  ;;  %v1929_v6 = vmov 0.0   ;;  %v129_v15 = vlaneseq }
  0x1d   :  { %1704 = vmatprep.subr.mxu0 %v1973_v0  ;;  %v45_v2 = vld [vmem:[#allocation3] sm:$0xff]  ;;  %v1979_v3 = vld [vmem:[#allocation6 + $0x8] sm:$0xff]  ;;  %v1984_v4 = vld [vmem:[#allocation6] sm:$0xff]  ;;  %1715 = vmatprep.subr.mxu1 %v1929_v6  ;;  %vm1930_vm1 = vmmov 0   ;;  %s1931_s0 = smov 64   ;;  %s1932_s1 = smov 96  }
  0x1e   :  { %1705 = vmatpush3.msra.mxu0 %v1973_v0  ;;  %1712 = vmatprep.mubr.msk.f32.mxu0 %vm47_vm0, %v45_v2  ;;  %v46_v5 = vld [vmem:[#allocation3 + $0x8] sm:$0xff]  ;;  %s1933_s21 = smov 88   ;;  %s1934_s22 = smov 120   ;;  %vm137_vm2 = vcmask 64512   ;;  %v130_v16 = vshrl.u32 %v129_v15, 7  ;;  %v132_v17 = vand.u32 127, %v129_v15 }
  0x1f   :  { %1706 = vmatprep.subr.mxu0 %v1975_v1  ;;  %1717 = vmatprep.mubr.msk.f32.mxu1 %vm1930_vm1, %v1929_v6  ;;  %s1935_s23 = smov 80   ;;  %s1936_s24 = smov 112   ;;  %vm473_vm4 = vcmask 130112   ;;  %vm646_vm5 = vcmask 195712   ;;  %vm819_vm6 = vcmask 261312  }
  0x20   :  { %1707 = vmatpush3.msra.mxu0 %v1975_v1  ;;  %vm2029_vm3 = vcmp.le.s32.totalorder %v132_v17, %v130_v16  ;;  %s1937_s25 = smov 72   ;;  %s1938_s26 = smov 104  }
  0x21   :  { %1708 = vmatprep.subr.mxu0 %v1979_v3  ;;  %s1939_s27 = smov 48   ;;  %s1940_s28 = smov 56  }
  0x22   :  { %1709 = vmatpush3.msra.mxu0 %v1979_v3  ;;  %s1941_s29 = smov 40   ;;  %s1942_s30 = smov 16  }
  0x23   :  { %1710 = vmatprep.subr.mxu0 %v1984_v4  ;;  %s1943_s3 = smov 24   ;;  %s1944_s4 = smov 32  }
  0x24   :  { %1711 = vmatpush3.msra.mxu0 %v1984_v4  ;;  %s1945_s5 = smov [#allocation8]  }
  0x25   :  { %1713 = vmatmul.mubr.msk.f32.vlgmr.msra.gmra.mxu0 %vm47_vm0, %v46_v5  ;;  %1735 = vmatprep.subr.mxu0 %v1929_v6  ;;  %s1618_s6 = sshll.u32 %s1945_s5, 4  ;;  %s1619_s6 = int_to_ptr.vmem [resolvable:$true] %s1618_s6 }
  0x26   :  { %1737 = vmatprep.mubr.msk.f32.mxu0 %vm1930_vm1, %v1929_v6  ;;  %s1899_s7 = scalar_lea.vmem %s1619_s6, 256  ;;  %p1904_p11 = scmp.lt.s32.totalorder %s1619_s6, %s1619_s6 }
  0x27   :  { %p1900_p10 = scmp.ne.s32.totalorder %s1619_s6, %s1899_s7  ;;  %p1905_p12 = scmp.lt.s32.totalorder %s1899_s7, %s1899_s7 }
  0x29   :  { %p1906_p13 = por %p1905_p12, %p1904_p11 }
  0x2b   :  { %p1907_p0 = pnand %p1906_p13, %p1900_p10 }
  0xe5   :  { %v1997_v7 = vpop.f32.mrf.mxu0 }
  0xe7   :  { %v1999_v8 = vpop.f32.mrf.mxu0 }
  0xe8   :  { %225 = vrot.lane.b32.xlu1 %v1999_v8, %s1931_s0  ;;  %135 = vrot.lane.b32.xlu0 %v1999_v8, %s1932_s1 }
  0xec   :  { %304 = vrot.lane.b32.xlu1 %v1999_v8, %s1933_s21 }
  0xf0   :  { %302 = vrot.lane.b32.xlu1 %v1999_v8, %s1934_s22 }
  0xf4   :  { %477 = vrot.lane.b32.xlu1 %v1999_v8, %s1935_s23 }
  0xf8   :  { %475 = vrot.lane.b32.xlu1 %v1999_v8, %s1936_s24 }
 0x15a   :  { %v226_v9 = vpop.permute.xlu1 %225  ;;  %v136_v10 = vpop.permute.xlu0 %135 }
 0x15b   :  { %1716 = vmatpush3.xpose.msk.msra.mxu1 %vm137_vm2, %v136_v10 }
 0x15c   :  { %1720 = vmatprep.subr.mxu1 %v1929_v6 }
 0x15e   :  { %v2015_v11 = vpop.permute.xlu1 %304  ;;  %1718 = vmatmul.mubr.msk.f32.vlgmr.msra.gmra.mxu1 %vm137_vm2, %v1999_v8 }
 0x15f   :  { %1721 = vmatpush3.msra.mxu1 %v226_v9  ;;  %1722 = vmatprep.mubr.msk.f32.mxu1 %vm1930_vm1, %v1929_v6 }
 0x160   :  { %1725 = vmatprep.subr.mxu1 %v1929_v6 }
 0x162   :  { %v2022_v12 = vpop.permute.xlu1 %302 }
 0x166   :  { %v478_v13 = vpop.permute.xlu1 %477 }
 0x167   :  { %1736 = vmatpush3.xpose.msk.msra.mxu0 %vm137_vm2, %v478_v13 }
 0x168   :  { %1745 = vmatprep.subr.mxu0 %v1929_v6 }
 0x16a   :  { %v476_v14 = vpop.permute.xlu1 %475 }
 0x16b   :  { %1738 = vmatmul.mubr.msk.f32.vlgmr.msra.gmra.mxu0 %vm137_vm2, %v476_v14 }
 0x16c   :  { %1747 = vmatprep.mubr.msk.f32.mxu0 %vm1930_vm1, %v1929_v6 }
 0x21e   :  { %v208_v18 = vpop.f32.mrf.mxu1 }
 0x21f   :  { %v212_v20 = vmul.f32 0.35355338, %v208_v18 }
 0x220   :  { %v1719_v21 = vpop.f32.mrf.mxu1 }
 0x221   :  { %v213_v22 = vsel %vm2029_vm3, %v212_v20, -1e+30 }
 0x222   :  { %v214_v23 = vsel %vm137_vm2, %v213_v22, -inf }
 0x223   :  { %215 = vmax.xlane.f32.xlu0 %v214_v23 }
 0x22b   :  { %v549_v24 = vpop.f32.mrf.mxu0 }
 0x22c   :  { %v553_v26 = vmul.f32 0.35355338, %v549_v24 }
 0x22d   :  { %v1739_v25 = vpop.f32.mrf.mxu0 }
 0x22e   :  { %v2042_v27 = vsel %vm2029_vm3, %v553_v26, -1e+30 }
 0x22f   :  { %v555_v28 = vsel %vm137_vm2, %v2042_v27, -inf }
 0x239   :  { %650 = vrot.lane.b32.xlu0 %v1999_v8, %s1937_s25 }
 0x23d   :  { %1160 = vrot.lane.b32.xlu0 %v1997_v7, %s1936_s24 }
 0x241   :  { %1332 = vrot.lane.b32.xlu0 %v1997_v7, %s1938_s26 }
 0x260   :  { %556 = vmax.xlane.f32.xlu0 %v555_v28 }
 0x2ac   :  { %v216_v29 = vpop.xlane.xlu0 %215 }
 0x2ad   :  { %v217_v30 = vsub.f32 %v213_v22, %v216_v29 }
 0x2af   :  { %v218_v31 = vmul.f32 1.442695, %v217_v30 }
 0x2b0   :  { %v651_v32 = vpop.permute.xlu0 %650 }
 0x2b1   :  { %1827 = vpow2.f32 %v218_v31  ;;  %1746 = vmatpush3.xpose.msk.msra.mxu0 %vm137_vm2, %v651_v32 }
 0x2b2   :  { %1755 = vmatprep.subr.mxu0 %v1929_v6 }
 0x2b4   :  { %v1161_v43 = vpop.permute.xlu0 %1160 }
 0x2b8   :  { %v1333_v45 = vpop.permute.xlu0 %1332 }
 0x2be   :  { %v1828_v33 = vpop.eup %1827 }
 0x2bf   :  { %v220_v34 = vsel %vm137_vm2, %v1828_v33, 0.0 }
 0x2c0   :  { %221 = vadd.xlane.f32.xlu1 %v220_v34 }
 0x2d1   :  { %648 = vrot.lane.b32.xlu1 %v1999_v8, %s1938_s26 }
 0x2d5   :  { %822 = vrot.lane.b32.xlu1 %v1997_v7, %s1932_s1 }
 0x2d9   :  { %990 = vrot.lane.b32.xlu1 %v1997_v7, %s1933_s21 }
 0x2dd   :  { %988 = vrot.lane.b32.xlu1 %v1997_v7, %s1934_s22 }
 0x2e1   :  { %1162 = vrot.lane.b32.xlu1 %v1997_v7, %s1935_s23 }
 0x2e5   :  { %1334 = vrot.lane.b32.xlu1 %v1997_v7, %s1937_s25 }
 0x2e9   :  { %v557_v50 = vpop.xlane.xlu0 %556 }
 0x2ea   :  { %v558_v52 = vsub.f32 %v2042_v27, %v557_v50 }
 0x2ec   :  { %v559_v55 = vmul.f32 1.442695, %v558_v52 }
 0x349   :  { %v222_v35 = vpop.xlane.xlu1 %221 }
 0x34a   :  { %1829 = vrcp.f32 %v222_v35 }
 0x34b   :  { %1831 = vpow2.f32 %v559_v55 }
 0x34d   :  { %v649_v36 = vpop.permute.xlu1 %648 }
 0x34e   :  { %1748 = vmatmul.mubr.msk.f32.vlgmr.msra.gmra.mxu0 %vm137_vm2, %v649_v36 }
 0x34f   :  { %1757 = vmatprep.mubr.msk.f32.mxu0 %vm1930_vm1, %v1929_v6 }
 0x351   :  { %v823_v37 = vpop.permute.xlu1 %822 }
 0x352   :  { %1756 = vmatpush3.xpose.msk.msra.mxu0 %vm137_vm2, %v823_v37 }
 0x353   :  { %1765 = vmatprep.subr.mxu0 %v1929_v6 }
 0x355   :  { %v991_v38 = vpop.permute.xlu1 %990  ;;  %1758 = vmatmul.mubr.msk.f32.vlgmr.msra.gmra.mxu0 %vm137_vm2, %v1997_v7 }
 0x356   :  { %1766 = vmatpush3.xpose.msk.msra.mxu0 %vm137_vm2, %v991_v38  ;;  %1767 = vmatprep.mubr.msk.f32.mxu0 %vm1930_vm1, %v1929_v6 }
 0x357   :  { %v1830_v39 = vpop.eup %1829  ;;  %1775 = vmatprep.subr.mxu0 %v1929_v6 }
 0x358   :  { %v224_v40 = vmul.f32 %v1830_v39, %v1828_v33  ;;  %v2112_v24 = vpop.eup %1831 }
 0x359   :  { %v989_v41 = vpop.permute.xlu1 %988  ;;  %v561_v26 = vsel %vm137_vm2, %v2112_v24, 0.0 }
 0x35a   :  { %1723 = vmatmul.mubr.msk.f32.vlgmr.msra.gmra.mxu1 %vm137_vm2, %v224_v40  ;;  %1768 = vmatmul.mubr.msk.f32.vlgmr.msra.gmra.mxu0 %vm137_vm2, %v989_v41 }
 0x35b   :  { %1726 = vmatpush3.xpose.msk.msra.mxu1 %vm137_vm2, %v2015_v11  ;;  %1727 = vmatprep.mubr.msk.f32.mxu1 %vm1930_vm1, %v1929_v6 }
 0x35c   :  { %1777 = vmatprep.mubr.msk.f32.mxu0 %vm1930_vm1, %v1929_v6  ;;  %1730 = vmatprep.subr.mxu1 %v1929_v6 }
 0x35d   :  { %v1163_v42 = vpop.permute.xlu1 %1162 }
 0x35e   :  { %1728 = vmatmul.mubr.msk.f32.vlgmr.msra.gmra.mxu1 %vm137_vm2, %v2022_v12  ;;  %1776 = vmatpush3.xpose.msk.msra.mxu0 %vm137_vm2, %v1163_v42 }
 0x35f   :  { %1785 = vmatprep.subr.mxu0 %v1929_v6  ;;  %1732 = vmatprep.mubr.msk.f32.mxu1 %vm1930_vm1, %v1929_v6 }
 0x361   :  { %v1335_v44 = vpop.permute.xlu1 %1334  ;;  %1778 = vmatmul.mubr.msk.f32.vlgmr.msra.gmra.mxu0 %vm137_vm2, %v1161_v43 }
 0x362   :  { %1786 = vmatpush3.xpose.msk.msra.mxu0 %vm137_vm2, %v1335_v44  ;;  %1787 = vmatprep.mubr.msk.f32.mxu0 %vm1930_vm1, %v1929_v6 }
 0x365   :  { %1788 = vmatmul.mubr.msk.f32.vlgmr.msra.gmra.mxu0 %vm137_vm2, %v1333_v45 }
 0x40e   :  { %v722_v46 = vpop.f32.mrf.mxu0 }
 0x40f   :  { %v726_v47 = vmul.f32 0.35355338, %v722_v46 }
 0x410   :  { %v1749_v48 = vpop.f32.mrf.mxu0 }
 0x411   :  { %v727_v49 = vsel %vm2029_vm3, %v726_v47, -1e+30 }
 0x412   :  { %v728_v51 = vsel %vm137_vm2, %v727_v49, -inf }
 0x413   :  { %729 = vmax.xlane.f32.xlu0 %v728_v51 }
 0x415   :  { %v894_v53 = vpop.f32.mrf.mxu0 }
 0x416   :  { %v898_v2 = vmul.f32 0.35355338, %v894_v53 }
 0x417   :  { %v1759_v54 = vpop.f32.mrf.mxu0 }
 0x418   :  { %v899_v15 = vsel %vm2029_vm3, %v898_v2, -1e+30 }
 0x419   :  { %v900_v18 = vsel %vm137_vm2, %v899_v15, -inf }
 0x41a   :  { %v297_v56 = vpop.f32.mrf.mxu1  ;;  %v1062_v57 = vpop.f32.mrf.mxu0 }
 0x41b   :  { %301 = vst.msk [vmem:[#allocation2] sm:$0xff] %vm137_vm2, %v297_v56  ;;  %v1066_v58 = vmul.f32 0.35355338, %v1062_v57 }
 0x41c   :  { %v1724_v59 = vpop.f32.mrf.mxu1  ;;  %v1769_v60 = vpop.f32.mrf.mxu0 }
 0x41d   :  { %v1067_v61 = vsel %vm2029_vm3, %v1066_v58, -1e+30 }
 0x41e   :  { %v376_v62 = vpop.f32.mrf.mxu1  ;;  %v1068_v63 = vsel %vm137_vm2, %v1067_v61, -inf }
 0x41f   :  { %v380_v5 = vmul.f32 0.35355338, %v376_v62  ;;  %1069 = vmax.xlane.f32.xlu0 %v1068_v63 }
 0x420   :  { %v1729_v9 = vpop.f32.mrf.mxu1 }
 0x421   :  { %v1234_v10 = vpop.f32.mrf.mxu0  ;;  %v2100_v11 = vsel %vm2029_vm3, %v380_v5, -1e+30 }
 0x422   :  { %v382_v12 = vsel %vm137_vm2, %v2100_v11, -inf  ;;  %v1238_v13 = vmul.f32 0.35355338, %v1234_v10 }
 0x423   :  { %v1779_v14 = vpop.f32.mrf.mxu0  ;;  %383 = vmax.xlane.f32.xlu1 %v382_v12 }
 0x424   :  { %v1239_v21 = vsel %vm2029_vm3, %v1238_v13, -1e+30 }
 0x425   :  { %v1406_v16 = vpop.f32.mrf.mxu0  ;;  %v1240_v25 = vsel %vm137_vm2, %v1239_v21, -inf }
 0x426   :  { %v1410_v17 = vmul.f32 0.35355338, %v1406_v16 }
 0x427   :  { %v1789_v20 = vpop.f32.mrf.mxu0  ;;  %901 = vmax.xlane.f32.xlu1 %v900_v18 }
 0x428   :  { %v1411_v22 = vsel %vm2029_vm3, %v1410_v17, -1e+30 }
 0x429   :  { %v1412_v23 = vsel %vm137_vm2, %v1411_v22, -inf }
 0x42a   :  { %1413 = vmax.xlane.f32.xlu0 %v1412_v23 }
 0x42b   :  { %1241 = vmax.xlane.f32.xlu1 %v1240_v25 }
 0x42e   :  { %562 = vadd.xlane.f32.xlu0 %v561_v26 }
 0x49c   :  { %v730_v27 = vpop.xlane.xlu0 %729 }
 0x49d   :  { %v731_v28 = vsub.f32 %v727_v49, %v730_v27 }
 0x49f   :  { %v732_v29 = vmul.f32 1.442695, %v731_v28 }
 0x4a1   :  { %1833 = vpow2.f32 %v732_v29 }
 0x4a8   :  { %v1070_v30 = vpop.xlane.xlu0 %1069 }
 0x4a9   :  { %v1071_v31 = vsub.f32 %v1067_v61, %v1070_v30 }
 0x4ab   :  { %v1072_v19 = vmul.f32 1.442695, %v1071_v31 }
 0x4ac   :  { %v384_v32 = vpop.xlane.xlu1 %383 }
 0x4ad   :  { %1835 = vpow2.f32 %v1072_v19  ;;  %v385_v52 = vsub.f32 %v2100_v11, %v384_v32 }
 0x4ae   :  { %v2117_v33 = vpop.eup %1833 }
 0x4af   :  { %v734_v34 = vsel %vm137_vm2, %v2117_v33, 0.0  ;;  %v386_v53 = vmul.f32 1.442695, %v385_v52 }
 0x4b0   :  { %735 = vadd.xlane.f32.xlu1 %v734_v34  ;;  %v902_v35 = vpop.xlane.xlu1 %901 }
 0x4b1   :  { %v903_v36 = vsub.f32 %v899_v15, %v902_v35 }
 0x4b3   :  { %v904_v37 = vmul.f32 1.442695, %v903_v36  ;;  %v1414_v38 = vpop.xlane.xlu0 %1413 }
 0x4b4   :  { %v1415_v39 = vsub.f32 %v1411_v22, %v1414_v38  ;;  %v1242_v40 = vpop.xlane.xlu1 %1241  ;;  %v1657_v38 = vld [vmem:[#allocation6 + $0x20] ss:$0 sm:$0xff] }
 0x4b5   :  { %1837 = vpow2.f32 %v904_v37  ;;  %v1243_v41 = vsub.f32 %v1239_v21, %v1242_v40 }
 0x4b6   :  { %v1416_v42 = vmul.f32 1.442695, %v1415_v39 }
 0x4b7   :  { %v1244_v43 = vmul.f32 1.442695, %v1243_v41  ;;  %v563_v56 = vpop.xlane.xlu0 %562 }
 0x4b8   :  { %1839 = vpow2.f32 %v1416_v42 }
 0x4b9   :  { %1841 = vpow2.f32 %v1244_v43 }
 0x4ba   :  { %v2121_v44 = vpop.eup %1835  ;;  %1843 = vpow2.f32 %v386_v53 }
 0x4bb   :  { %v1074_v45 = vsel %vm137_vm2, %v2121_v44, 0.0 }
 0x4bc   :  { %1075 = vadd.xlane.f32.xlu1 %v1074_v45 }
 0x4c2   :  { %v2125_v46 = vpop.eup %1837 }
 0x4c3   :  { %v906_v47 = vsel %vm137_vm2, %v2125_v46, 0.0 }
 0x4c4   :  { %907 = vadd.xlane.f32.xlu0 %v906_v47 }
 0x4c5   :  { %v2129_v48 = vpop.eup %1839 }
 0x4c6   :  { %v2131_v49 = vpop.eup %1841  ;;  %v1418_v50 = vsel %vm137_vm2, %v2129_v48, 0.0 }
 0x4c7   :  { %1419 = vadd.xlane.f32.xlu1 %v1418_v50  ;;  %v1246_v51 = vsel %vm137_vm2, %v2131_v49, 0.0  ;;  %v1844_v54 = vpop.eup %1843 }
 0x4c8   :  { %1247 = vadd.xlane.f32.xlu0 %v1246_v51  ;;  %v388_v55 = vsel %vm137_vm2, %v1844_v54, 0.0 }
 0x4d8   :  { %566 = vrot.lane.b32.xlu1 %v1999_v8, %s1939_s27 }
 0x4de   :  { %393 = vrot.lane.b32.xlu0 %v1999_v8, %s1940_s28 }
 0x4e2   :  { %911 = vrot.lane.b32.xlu0 %v1997_v7, %s1931_s0 }
 0x4e6   :  { %1251 = vrot.lane.b32.xlu0 %v1997_v7, %s1939_s27 }
 0x4fc   :  { %389 = vadd.xlane.f32.xlu1 %v388_v55 }
 0x50d   :  { %739 = vrot.lane.b32.xlu1 %v1999_v8, %s1941_s29 }
 0x511   :  { %1079 = vrot.lane.b32.xlu1 %v1997_v7, %s1940_s28 }
 0x515   :  { %1423 = vrot.lane.b32.xlu1 %v1997_v7, %s1941_s29 }
 0x539   :  { %v736_v60 = vpop.xlane.xlu1 %735 }
 0x545   :  { %v1076_v61 = vpop.xlane.xlu1 %1075 }
 0x54d   :  { %v908_v57 = vpop.xlane.xlu0 %907 }
 0x550   :  { %v1420_v62 = vpop.xlane.xlu1 %1419 }
 0x551   :  { %v1248_v58 = vpop.xlane.xlu0 %1247 }
 0x554   :  { %v567_v63 = vpop.permute.xlu1 %566 }
 0x555   :  { %v394_v59 = vpop.permute.xlu0 %393 }
 0x556   :  { %1731 = vmatpush3.msra.mxu1 %v394_v59 }
 0x557   :  { %1740 = vmatprep.subr.mxu1 %v1929_v6 }
 0x559   :  { %v912_v14 = vpop.permute.xlu0 %911 }
 0x55d   :  { %v1252_v21 = vpop.permute.xlu0 %1251 }
 0x585   :  { %v390_v2 = vpop.xlane.xlu1 %389 }
 0x586   :  { %1845 = vrcp.f32 %v390_v2 }
 0x587   :  { %1847 = vrcp.f32 %v563_v56 }
 0x588   :  { %1849 = vrcp.f32 %v736_v60 }
 0x589   :  { %1851 = vrcp.f32 %v908_v57  ;;  %v740_v11 = vpop.permute.xlu1 %739 }
 0x58a   :  { %1853 = vrcp.f32 %v1076_v61 }
 0x58b   :  { %1855 = vrcp.f32 %v1248_v58 }
 0x58c   :  { %1857 = vrcp.f32 %v1420_v62 }
 0x58d   :  { %v1080_v17 = vpop.permute.xlu1 %1079 }
 0x593   :  { %v1846_v8 = vpop.eup %1845 }
 0x594   :  { %v392_v5 = vmul.f32 %v1846_v8, %v1844_v54  ;;  %v1848_v7 = vpop.eup %1847 }
 0x595   :  { %v565_v9 = vmul.f32 %v1848_v7, %v2112_v24  ;;  %v1850_v10 = vpop.eup %1849  ;;  %v1424_v24 = vpop.permute.xlu1 %1423 }
 0x596   :  { %1733 = vmatmul.mubr.msk.f32.vlgmr.msra.gmra.mxu1 %vm137_vm2, %v392_v5  ;;  %v738_v12 = vmul.f32 %v1850_v10, %v2117_v33  ;;  %v1852_v13 = vpop.eup %1851 }
 0x597   :  { %1741 = vmatpush3.msra.mxu1 %v567_v63  ;;  %1742 = vmatprep.mubr.msk.f32.mxu1 %vm1930_vm1, %v1929_v6  ;;  %v910_v15 = vmul.f32 %v1852_v13, %v2125_v46  ;;  %v1854_v16 = vpop.eup %1853 }
 0x598   :  { %1750 = vmatprep.subr.mxu1 %v1929_v6  ;;  %v1078_v18 = vmul.f32 %v1854_v16, %v2121_v44  ;;  %v1856_v20 = vpop.eup %1855 }
 0x599   :  { %v1250_v22 = vmul.f32 %v1856_v20, %v2131_v49  ;;  %v1858_v23 = vpop.eup %1857 }
 0x59a   :  { %1743 = vmatmul.mubr.msk.f32.vlgmr.msra.gmra.mxu1 %vm137_vm2, %v565_v9  ;;  %v1422_v25 = vmul.f32 %v1858_v23, %v2129_v48 }
 0x59b   :  { %1751 = vmatpush3.msra.mxu1 %v740_v11  ;;  %1752 = vmatprep.mubr.msk.f32.mxu1 %vm1930_vm1, %v1929_v6 }
 0x59c   :  { %1760 = vmatprep.subr.mxu1 %v1929_v6 }
 0x59e   :  { %1753 = vmatmul.mubr.msk.f32.vlgmr.msra.gmra.mxu1 %vm137_vm2, %v738_v12 }
 0x59f   :  { %1761 = vmatpush3.msra.mxu1 %v912_v14  ;;  %1762 = vmatprep.mubr.msk.f32.mxu1 %vm1930_vm1, %v1929_v6 }
 0x5a0   :  { %1770 = vmatprep.subr.mxu1 %v1929_v6 }
 0x5a2   :  { %1763 = vmatmul.mubr.msk.f32.vlgmr.msra.gmra.mxu1 %vm137_vm2, %v910_v15 }
 0x5a3   :  { %1771 = vmatpush3.msra.mxu1 %v1080_v17  ;;  %1772 = vmatprep.mubr.msk.f32.mxu1 %vm1930_vm1, %v1929_v6 }
 0x5a4   :  { %1780 = vmatprep.subr.mxu1 %v1929_v6 }
 0x5a6   :  { %1773 = vmatmul.mubr.msk.f32.vlgmr.msra.gmra.mxu1 %vm137_vm2, %v1078_v18 }
 0x5a7   :  { %1781 = vmatpush3.msra.mxu1 %v1252_v21  ;;  %1782 = vmatprep.mubr.msk.f32.mxu1 %vm1930_vm1, %v1929_v6 }
 0x5a8   :  { %1790 = vmatprep.subr.mxu1 %v1929_v6 }
 0x5aa   :  { %1783 = vmatmul.mubr.msk.f32.vlgmr.msra.gmra.mxu1 %vm137_vm2, %v1250_v22 }
 0x5ab   :  { %1791 = vmatpush3.msra.mxu1 %v1424_v24  ;;  %1792 = vmatprep.mubr.msk.f32.mxu1 %vm1930_vm1, %v1929_v6 }
 0x5ae   :  { %1793 = vmatmul.mubr.msk.f32.vlgmr.msra.gmra.mxu1 %vm137_vm2, %v1422_v25 }
 0x656   :  { %v465_v26 = vpop.f32.mrf.mxu1 }
 0x657   :  { %470 = vrot.lane.b32.xlu0 %v465_v26, %s1927_s13 }
 0x658   :  { %v1734_v27 = vpop.f32.mrf.mxu1 }
 0x65a   :  { %v638_v28 = vpop.f32.mrf.mxu1 }
 0x65b   :  { %643 = vrot.lane.b32.xlu1 %v638_v28, %s1942_s30 }
 0x65c   :  { %v1744_v29 = vpop.f32.mrf.mxu1 }
 0x65e   :  { %v811_v30 = vpop.f32.mrf.mxu1 }
 0x65f   :  { %816 = vrot.lane.b32.xlu1 %v811_v30, %s1943_s3 }
 0x660   :  { %v1754_v31 = vpop.f32.mrf.mxu1 }
 0x662   :  { %v983_v19 = vpop.f32.mrf.mxu1 }
 0x663   :  { %987 = vst.msk [vmem:[#allocation2 + $0x8] sm:$0xff] %vm137_vm2, %v983_v19 }
 0x664   :  { %v1764_v6 = vpop.f32.mrf.mxu1 }
 0x666   :  { %v1151_v32 = vpop.f32.mrf.mxu1 }
 0x667   :  { %1156 = vrot.lane.b32.xlu0 %v1151_v32, %s1927_s13 }
 0x668   :  { %v1774_v33 = vpop.f32.mrf.mxu1 }
 0x66a   :  { %v1323_v34 = vpop.f32.mrf.mxu1 }
 0x66b   :  { %1328 = vrot.lane.b32.xlu0 %v1323_v34, %s1942_s30 }
 0x66c   :  { %v1784_v35 = vpop.f32.mrf.mxu1 }
 0x66e   :  { %v1495_v36 = vpop.f32.mrf.mxu1 }
 0x66f   :  { %1500 = vrot.lane.b32.xlu1 %v1495_v36, %s1943_s3  ;;  %1520 = vrot.lane.b32.xlu0 %v1973_v0, %s1944_s4 }
 0x670   :  { %v1794_v37 = vpop.f32.mrf.mxu1 }
 0x673   :  { %1518 = vrot.lane.b32.xlu1 %v1975_v1, %s1944_s4  ;;  %1516 = vrot.lane.b32.xlu0 %v1979_v3, %s1944_s4 }
 0x677   :  { %1514 = vrot.lane.b32.xlu1 %v1984_v4, %s1944_s4  ;;  %1527 = vrot.lane.b32.xlu0 %v1657_v38, %s1944_s4 }
 0x6c9   :  { %v471_v39 = vpop.permute.xlu0 %470 }
 0x6ca   :  { %474 = vst.msk [vmem:[#allocation2] sm:$0xff] %vm473_vm4, %v471_v39 }
 0x6cd   :  { %v644_v40 = vpop.permute.xlu1 %643 }
 0x6ce   :  { %647 = vst.msk [vmem:[#allocation2] sm:$0xff] %vm646_vm5, %v644_v40 }
 0x6d1   :  { %v817_v41 = vpop.permute.xlu1 %816 }
 0x6d2   :  { %820 = vst.msk [vmem:[#allocation2] sm:$0xff] %vm819_vm6, %v817_v41 }
 0x6d9   :  { %v1157_v42 = vpop.permute.xlu0 %1156  ;;  %v1504_v0 = vld [vmem:[#allocation2] sm:$0xff] }
 0x6da   :  { %1159 = vst.msk [vmem:[#allocation2 + $0x8] sm:$0xff] %vm473_vm4, %v1157_v42  ;;  %1803 = vmatprep.mubr.msk.f32.mxu0 %vm47_vm0, %v1504_v0 }
 0x6dd   :  { %v1329_v1 = vpop.permute.xlu0 %1328 }
 0x6de   :  { %1331 = vst.msk [vmem:[#allocation2 + $0x8] sm:$0xff] %vm646_vm5, %v1329_v1 }
 0x6e1   :  { %v1501_v3 = vpop.permute.xlu1 %1500  ;;  %v1521_v43 = vpop.permute.xlu0 %1520 }
 0x6e2   :  { %1503 = vst.msk [vmem:[#allocation2 + $0x8] sm:$0xff] %vm819_vm6, %v1501_v3  ;;  %1795 = vmatprep.subr.mxu0 %v1521_v43 }
 0x6e3   :  { %1796 = vmatpush3.msra.mxu0 %v1521_v43 }
 0x6e5   :  { %v1519_v4 = vpop.permute.xlu1 %1518  ;;  %v1517_v44 = vpop.permute.xlu0 %1516 }
 0x6e6   :  { %1797 = vmatprep.subr.mxu0 %v1519_v4 }
 0x6e7   :  { %1798 = vmatpush3.msra.mxu0 %v1519_v4 }
 0x6e8   :  { %1799 = vmatprep.subr.mxu0 %v1517_v44 }
 0x6e9   :  { %1800 = vmatpush3.msra.mxu0 %v1517_v44  ;;  %v1515_v45 = vpop.permute.xlu1 %1514  ;;  %v1505_v46 = vld [vmem:[#allocation2 + $0x8] sm:$0xff]  ;;  %v1528_v47 = vpop.permute.xlu0 %1527 }
 0x6ea   :  { %1801 = vmatprep.subr.mxu0 %v1515_v45 }
 0x6eb   :  { %1802 = vmatpush3.msra.mxu0 %v1515_v45 }
 0x6ec   :  { %1804 = vmatmul.mubr.msk.f32.vlgmr.msra.gmra.mxu0 %vm47_vm0, %v1505_v46 }
 0x7ac   :  { %v1805_v48 = vpop.f32.mrf.mxu0 }
 0x7ad   :  { %v1608_v49 = vadd.f32 %v1805_v48, %v1528_v47 }
 0x7ae   :  { %v1602_v50 = vpop.f32.mrf.mxu0 }
 0x7af   :  { %1612 = vst.msk [vmem:[#allocation8 + $0x8] sm:$0xff] %vm47_vm0, %v1608_v49  ;;  %v1603_v51 = vadd.f32 %v1602_v50, %v1528_v47 }
 0x7b1   :  { %1611 = vst.msk [vmem:[#allocation8] sm:$0xff] %vm47_vm0, %v1603_v51 }
 0x7b2   :  { %1910 = shalt.err (!%p1907_p0)
}
 0x7b3   :  { %1624 = dma.vmem_to_hbm [thread:$0]  %s1619_s6, 256, %s2197_s2, [#allocation5], %s1926_s12, %s1926_s12, %s1927_s13  }
 0x7b4   :  { %1923 = dma.done.wait [#allocation5], 256  }
 0x7b5   :  { %1924 = vsyncadd [#allocation5], 4294967040 }
 0x7b6   :  { %1628 = vsyncpa [#allocation4], 1 }
 0x7b7   :  { %1629 = vsyncpa [#allocation7], 1 }
 0x7b8   :  { %1630 = vsyncpa [#allocation5], 1 }

</bundles_post_ra>
